<compile_context>
chip_gen: v5e
topology: v5e:2x2
jax: 0.10.0
libtpu: 0.0.40
codegen_flags: <defaults>
</compile_context>

<pallas_src>
import functools

import jax
import jax.numpy as jnp
from jax.experimental import pallas as pl
from jax.experimental.pallas import tpu as pltpu


_BIG = 1e30        # finite sentinel for padded points (inf -> 0*inf NaN in MXU)
_TILE_MAX = 256    # point-axis tile (multiple of 128; M/N dims of the matmul)


def _round_up(x, m):
    return ((x + m - 1) // m) * m


def _vmem_capacity_bytes():
    try:
        return int(pltpu.get_tpu_info().vmem_capacity_bytes)
    except Exception:
        return 64 * 1024 * 1024


def _tensorcores_per_chip():
    # Heuristic: v7x exposes 2 TensorCores to the grid scheduler (v4/v5p are
    # megacore); v5e/v6e have a single TC, where forcing >=2 grid iterations
    # on the batch axis only adds per-step overhead.
    try:
        kind = jax.devices()[0].device_kind.lower()
    except Exception:
        return 1
    if "v7" in kind or "v4" in kind or "v5p" in kind:
        return 2
    return 1


def _chamfer_kernel(g_ref, p_ref, out1_ref, out2_ref, *, tile_i, tile_j):
    # g_ref:    (Bt, tile_i, D+2)  augmented gts   block [-2*g | xx+bias | 1]
    # p_ref:    (Bt, tile_j, D+2)  augmented preds block [  p  |    1    | yy+bias]
    # out1_ref: (1, Bt, Np_pad)    per-pred-point running min over gt blocks
    # out2_ref: (1, Bt, Ng_pad)    per-gt-point  running min over pred blocks
    i = pl.program_id(1)
    j = pl.program_id(2)

    # Single MXU contraction yields xx + yy - 2<g,p> (+ padding bias) directly;
    # no full-matrix VPU passes for norms or padding masks.
    dists = jnp.einsum("bik,bjk->bij", g_ref[...], p_ref[...],
                       preferred_element_type=jnp.float32)   # (Bt, tile_i, tile_j)

    min_over_i = jnp.min(dists, axis=1)                       # (Bt, tile_j)
    min_over_j = jnp.min(dists, axis=2)                       # (Bt, tile_i)

    j_off = pl.multiple_of(j * tile_j, 128)
    i_off = pl.multiple_of(i * tile_i, 128)

    # ---- loss_1 accumulator: min over the gt axis (grid axis 1) ----
    @pl.when(i == 0)
    def _():
        out1_ref[:, :, pl.ds(j_off, tile_j)] = min_over_i[None]

    @pl.when(i > 0)
    def _():
        cur = out1_ref[:, :, pl.ds(j_off, tile_j)]
        out1_ref[:, :, pl.ds(j_off, tile_j)] = jnp.minimum(cur, min_over_i[None])

    # ---- loss_2 accumulator: min over the pred axis (grid axis 2) ----
    @pl.when(j == 0)
    def _():
        out2_ref[:, :, pl.ds(i_off, tile_i)] = min_over_j[None]

    @pl.when(j > 0)
    def _():
        cur = out2_ref[:, :, pl.ds(i_off, tile_i)]
        out2_ref[:, :, pl.ds(i_off, tile_i)] = jnp.minimum(cur, min_over_j[None])


def augm_chamfer_loss(preds, gts):
    """preds: (bs, Np, D), gts: (bs, Ng, D) -> scalar f32 loss."""
    bs, n_preds, d = preds.shape
    bs_g, n_gts, d_g = gts.shape
    assert bs == bs_g and d == d_g
    assert n_gts > 0 and n_preds > 0, "empty point clouds are not supported"

    gts = gts.astype(jnp.float32)
    preds = preds.astype(jnp.float32)

    # ---- point-axis tiling (lane-dense: multiples of 128) ----
    tile_i = min(_TILE_MAX, _round_up(n_gts, 128))
    tile_j = min(_TILE_MAX, _round_up(n_preds, 128))
    ng_pad = _round_up(n_gts, tile_i)
    np_pad = _round_up(n_preds, tile_j)
    num_i = ng_pad // tile_i
    num_j = np_pad // tile_j
    k_aug = d + 2

    # ---- generation-aware VMEM budget -> batch tile ----
    vmem_cap = _vmem_capacity_bytes()
    budget = min(max(vmem_cap // 4, 12 * 1024 * 1024), 32 * 1024 * 1024)
    per_b = 4 * (2 * 128 * (tile_i + tile_j)     # double-buffered inputs (K lane-padded)
                 + 3 * tile_i * tile_j           # distance block + temporaries
                 + 2 * (ng_pad + np_pad))        # resident per-point min slabs
    n_tc = _tensorcores_per_chip()
    b_tile = max(1, min(bs, budget // per_b))
    if n_tc > 1 and bs > 1:
        b_tile = min(b_tile, -(-bs // n_tc))     # keep >= n_tc batch tiles (v7x)
    num_b = -(-bs // b_tile)
    if n_tc > 1 and num_b > 1 and num_b % n_tc:
        num_b = _round_up(num_b, n_tc)           # even load balance across cores
    bs_pad = num_b * b_tile

    # ---- augmented operands: norms + padding bias folded into the matmul ----
    xx = jnp.sum(gts * gts, axis=-1)             # (bs, Ng)
    yy = jnp.sum(preds * preds, axis=-1)         # (bs, Np)
    g_aug = jnp.concatenate(
        [gts * jnp.float32(-2.0), xx[..., None],
         jnp.ones((bs, n_gts, 1), jnp.float32)], axis=-1)
    p_aug = jnp.concatenate(
        [preds, jnp.ones((bs, n_preds, 1), jnp.float32), yy[..., None]], axis=-1)

    def _pad(a, n_pad, norm_col):
        b_cur, n_cur, _ = a.shape
        a = jnp.pad(a, ((0, bs_pad - b_cur), (0, n_pad - n_cur), (0, 0)))
        if n_pad > n_cur:
            bias = jnp.where(jnp.arange(n_pad) >= n_cur,
                             jnp.float32(_BIG), jnp.float32(0.0))
            a = a.at[:, :, norm_col].add(bias[None, :])
        return a

    g_aug = _pad(g_aug, ng_pad, d)        # bias goes into the xx column
    p_aug = _pad(p_aug, np_pad, d + 1)    # bias goes into the yy column

    kernel = functools.partial(_chamfer_kernel, tile_i=tile_i, tile_j=tile_j)
    vmem_limit = int(min(max(2 * budget, 32 * 1024 * 1024), vmem_cap * 3 // 4))
    bytes_accessed = 4 * (g_aug.size + p_aug.size + bs_pad * (np_pad + ng_pad))

    out1, out2 = pl.pallas_call(
        kernel,
        out_shape=(
            jax.ShapeDtypeStruct((num_b, b_tile, np_pad), jnp.float32),
            jax.ShapeDtypeStruct((num_b, b_tile, ng_pad), jnp.float32),
        ),
        grid_spec=pltpu.PrefetchScalarGridSpec(
            num_scalar_prefetch=0,
            grid=(num_b, num_i, num_j),
            in_specs=[
                pl.BlockSpec((b_tile, tile_i, k_aug), lambda b, i, j: (b, i, 0)),
                pl.BlockSpec((b_tile, tile_j, k_aug), lambda b, i, j: (b, j, 0)),
            ],
            out_specs=[
                pl.BlockSpec((1, b_tile, np_pad), lambda b, i, j: (b, 0, 0)),
                pl.BlockSpec((1, b_tile, ng_pad), lambda b, i, j: (b, 0, 0)),
            ],
        ),
        compiler_params=pltpu.CompilerParams(
            dimension_semantics=("parallel", "arbitrary", "arbitrary"),
            vmem_limit_bytes=vmem_limit,
        ),
        cost_estimate=pl.CostEstimate(
            flops=2 * bs_pad * ng_pad * np_pad * k_aug,
            transcendentals=0,
            bytes_accessed=bytes_accessed),
    )(g_aug, p_aug)

    # Padded batch rows / padded points are simply sliced away; divide by the
    # true counts (matches torch.mean over the (bs, N) min matrices).
    out1 = out1.reshape(bs_pad, np_pad)
    out2 = out2.reshape(bs_pad, ng_pad)
    loss_1 = jnp.sum(out1[:bs, :n_preds]) / jnp.float32(bs * n_preds)
    loss_2 = jnp.sum(out2[:bs, :n_gts]) / jnp.float32(bs * n_gts)
    return jnp.maximum(loss_1, loss_2)


def _reference_loss(preds, gts):
    # Pure-JAX reference of the PyTorch forward for verification.
    xx = jnp.sum(gts * gts, axis=-1)
    yy = jnp.sum(preds * preds, axis=-1)
    zz = jnp.einsum("bid,bjd->bij", gts, preds)
    P = xx[:, :, None] + yy[:, None, :] - 2.0 * zz
    loss_1 = jnp.mean(jnp.min(P, axis=1))
    loss_2 = jnp.mean(jnp.min(P, axis=2))
    return jnp.maximum(loss_1, loss_2)


if __name__ == "__main__":
    key = jax.random.PRNGKey(0)
    k1, k2, k3, k4 = jax.random.split(key, 4)

    # Small canonical shape.
    bs, n_gts, n_preds, d = 2, 128, 64, 8
    gts = jax.random.normal(k1, (bs, n_gts, d), dtype=jnp.float32)
    preds = jax.random.normal(k2, (bs, n_preds, d), dtype=jnp.float32)
    out = jax.block_until_ready(augm_chamfer_loss(preds, gts))
    ref = jax.block_until_ready(_reference_loss(preds, gts))
    assert jnp.allclose(out, ref, rtol=5e-4, atol=5e-4), (out, ref)

    # Awkward (non-aligned, non-divisor) shape exercising point tiling,
    # padded points and batch padding.
    bs2, n_gts2, n_preds2 = 3, 200, 300
    gts2 = jax.random.normal(k3, (bs2, n_gts2, d), dtype=jnp.float32)
    preds2 = jax.random.normal(k4, (bs2, n_preds2, d), dtype=jnp.float32)
    out2 = jax.block_until_ready(augm_chamfer_loss(preds2, gts2))
    ref2 = jax.block_until_ready(_reference_loss(preds2, gts2))
    assert jnp.allclose(out2, ref2, rtol=5e-4, atol=5e-4), (out2, ref2)

    print("KERNEL_OK")
</pallas_src>

<mosaic_0001>
module attributes {stable_mosaic.version = 11 : i64} {
  func.func @_chamfer_kernel(%arg0: i32, %arg1: i32, %arg2: i32, %arg3: memref<2x128x10xf32, #tpu.memory_space<vmem>>, %arg4: memref<2x128x10xf32, #tpu.memory_space<vmem>>, %arg5: memref<1x2x128xf32, #tpu.memory_space<vmem>>, %arg6: memref<1x2x128xf32, #tpu.memory_space<vmem>>) attributes {dimension_semantics = [#tpu.dimension_semantics<parallel>, #tpu.dimension_semantics<arbitrary>, #tpu.dimension_semantics<arbitrary>], iteration_bounds = array<i64: 1, 1, 1>, scalar_prefetch = 0 : i64, scratch_operands = 0 : i64, tpu.core_type = #tpu.core_type<tc>, window_params = [{transform_indices = @transform_0, window_bounds = array<i64: 2, 128, 10>}, {transform_indices = @transform_1, window_bounds = array<i64: 2, 128, 10>}, {transform_indices = @transform_2, window_bounds = array<i64: 1, 2, 128>}, {transform_indices = @transform_3, window_bounds = array<i64: 1, 2, 128>}]} {
    %c0 = arith.constant 0 : index
    %c0_0 = arith.constant 0 : index
    %c0_1 = arith.constant 0 : index
    %0 = vector.load %arg3[%c0, %c0_0, %c0_1] : memref<2x128x10xf32, #tpu.memory_space<vmem>>, vector<2x128x10xf32>
    %c0_2 = arith.constant 0 : index
    %c0_3 = arith.constant 0 : index
    %c0_4 = arith.constant 0 : index
    %1 = vector.load %arg4[%c0_2, %c0_3, %c0_4] : memref<2x128x10xf32, #tpu.memory_space<vmem>>, vector<2x128x10xf32>
    "tpu.trace_start"() <{level = 10 : i32, message = "bik,bjk->bij"}> : () -> ()
    %cst = arith.constant dense<0.000000e+00> : vector<2x128x128xf32>
    %2 = tpu.matmul %0, %1, %cst {dimension_numbers = #tpu.dot_dimension_numbers<[2], [2], [1], [1], [0, 0, 0, 1, 1, 1], [0], [0]>} : vector<2x128x10xf32>, vector<2x128x10xf32>, vector<2x128x128xf32> -> vector<2x128x128xf32>
    "tpu.trace_stop"() : () -> ()
    %cst_5 = arith.constant dense<0x7F800000> : vector<2x128xf32>
    %3 = vector.multi_reduction <minimumf>, %2, %cst_5 [1] : vector<2x128x128xf32> to vector<2x128xf32>
    %cst_6 = arith.constant dense<0x7F800000> : vector<2x128xf32>
    %4 = vector.multi_reduction <minimumf>, %2, %cst_6 [2] : vector<2x128x128xf32> to vector<2x128xf32>
    %c128_i32 = arith.constant 128 : i32
    %5 = arith.muli %arg2, %c128_i32 : i32
    %6 = tpu.assume_multiple %5, 128 : i32
    %c128_i32_7 = arith.constant 128 : i32
    %7 = arith.muli %arg1, %c128_i32_7 : i32
    %8 = tpu.assume_multiple %7, 128 : i32
    %c0_i32 = arith.constant 0 : i32
    %9 = arith.cmpi eq, %arg1, %c0_i32 : i32
    %10 = arith.extui %9 : i1 to i32
    %c0_i32_8 = arith.constant 0 : i32
    %11 = arith.cmpi ne, %10, %c0_i32_8 : i32
    scf.if %11 {
      %21 = vector.shape_cast %3 : vector<2x128xf32> to vector<1x2x128xf32>
      %c0_15 = arith.constant 0 : index
      %c0_16 = arith.constant 0 : index
      %22 = arith.index_cast %6 : i32 to index
      %23 = vector.load %arg5[%c0_15, %c0_16, %22] : memref<1x2x128xf32, #tpu.memory_space<vmem>>, vector<1x2x128xf32>
      tpu.vector_store %arg5[%c0_15, %c0_16, %22], %21 {strides = array<i32>} : memref<1x2x128xf32, #tpu.memory_space<vmem>>, vector<1x2x128xf32>,
    } else {
    }
    %c0_i32_9 = arith.constant 0 : i32
    %12 = arith.cmpi sgt, %arg1, %c0_i32_9 : i32
    %13 = arith.extui %12 : i1 to i32
    %c0_i32_10 = arith.constant 0 : i32
    %14 = arith.cmpi ne, %13, %c0_i32_10 : i32
    scf.if %14 {
      %c0_15 = arith.constant 0 : index
      %c0_16 = arith.constant 0 : index
      %21 = arith.index_cast %6 : i32 to index
      %22 = vector.load %arg5[%c0_15, %c0_16, %21] : memref<1x2x128xf32, #tpu.memory_space<vmem>>, vector<1x2x128xf32>
      %23 = vector.shape_cast %3 : vector<2x128xf32> to vector<1x2x128xf32>
      %24 = arith.minimumf %22, %23 : vector<1x2x128xf32>
      %c0_17 = arith.constant 0 : index
      %c0_18 = arith.constant 0 : index
      %25 = arith.index_cast %6 : i32 to index
      %26 = vector.load %arg5[%c0_17, %c0_18, %25] : memref<1x2x128xf32, #tpu.memory_space<vmem>>, vector<1x2x128xf32>
      tpu.vector_store %arg5[%c0_17, %c0_18, %25], %24 {strides = array<i32>} : memref<1x2x128xf32, #tpu.memory_space<vmem>>, vector<1x2x128xf32>,
    } else {
    }
    %c0_i32_11 = arith.constant 0 : i32
    %15 = arith.cmpi eq, %arg2, %c0_i32_11 : i32
    %16 = arith.extui %15 : i1 to i32
    %c0_i32_12 = arith.constant 0 : i32
    %17 = arith.cmpi ne, %16, %c0_i32_12 : i32
    scf.if %17 {
      %21 = vector.shape_cast %4 : vector<2x128xf32> to vector<1x2x128xf32>
      %c0_15 = arith.constant 0 : index
      %c0_16 = arith.constant 0 : index
      %22 = arith.index_cast %8 : i32 to index
      %23 = vector.load %arg6[%c0_15, %c0_16, %22] : memref<1x2x128xf32, #tpu.memory_space<vmem>>, vector<1x2x128xf32>
      tpu.vector_store %arg6[%c0_15, %c0_16, %22], %21 {strides = array<i32>} : memref<1x2x128xf32, #tpu.memory_space<vmem>>, vector<1x2x128xf32>,
    } else {
    }
    %c0_i32_13 = arith.constant 0 : i32
    %18 = arith.cmpi sgt, %arg2, %c0_i32_13 : i32
    %19 = arith.extui %18 : i1 to i32
    %c0_i32_14 = arith.constant 0 : i32
    %20 = arith.cmpi ne, %19, %c0_i32_14 : i32
    scf.if %20 {
      %c0_15 = arith.constant 0 : index
      %c0_16 = arith.constant 0 : index
      %21 = arith.index_cast %8 : i32 to index
      %22 = vector.load %arg6[%c0_15, %c0_16, %21] : memref<1x2x128xf32, #tpu.memory_space<vmem>>, vector<1x2x128xf32>
      %23 = vector.shape_cast %4 : vector<2x128xf32> to vector<1x2x128xf32>
      %24 = arith.minimumf %22, %23 : vector<1x2x128xf32>
      %c0_17 = arith.constant 0 : index
      %c0_18 = arith.constant 0 : index
      %25 = arith.index_cast %8 : i32 to index
      %26 = vector.load %arg6[%c0_17, %c0_18, %25] : memref<1x2x128xf32, #tpu.memory_space<vmem>>, vector<1x2x128xf32>
      tpu.vector_store %arg6[%c0_17, %c0_18, %25], %24 {strides = array<i32>} : memref<1x2x128xf32, #tpu.memory_space<vmem>>, vector<1x2x128xf32>,
    } else {
    }
    return
  }
  func.func @transform_0(%arg0: i32, %arg1: i32, %arg2: i32) -> (i32, i32, i32) {
    %c0_i32 = arith.constant 0 : i32
    %c0_i32_0 = arith.constant 0 : i32
    return %arg0, %arg1, %c0_i32 : i32, i32, i32
  }
  func.func @transform_1(%arg0: i32, %arg1: i32, %arg2: i32) -> (i32, i32, i32) {
    %c0_i32 = arith.constant 0 : i32
    %c0_i32_0 = arith.constant 0 : i32
    return %arg0, %arg2, %c0_i32 : i32, i32, i32
  }
  func.func @transform_2(%arg0: i32, %arg1: i32, %arg2: i32) -> (i32, i32, i32) {
    %c0_i32 = arith.constant 0 : i32
    %c0_i32_0 = arith.constant 0 : i32
    %c0_i32_1 = arith.constant 0 : i32
    return %arg0, %c0_i32, %c0_i32_0 : i32, i32, i32
  }
  func.func @transform_3(%arg0: i32, %arg1: i32, %arg2: i32) -> (i32, i32, i32) {
    %c0_i32 = arith.constant 0 : i32
    %c0_i32_0 = arith.constant 0 : i32
    %c0_i32_1 = arith.constant 0 : i32
    return %arg0, %c0_i32, %c0_i32_0 : i32, i32, i32
  }
}

</mosaic_0001>

<bundles_post_ra>
// kernel: tpu_custom_call.1
= control target key start
LH: loop header
LB: loop body
LE: loop exit
PB: predicated region body
PF: predicated region fallthrough
CT: control target
= control target key end

     0   :  { %9 = vsyncpa [#allocation3], 0  ;;  %vm79_vm0 = vcmask 80896   ;;  %s1423_s0 = inlined_call_operand.vmem [shape: f32[2,128,10], index: 0, kind: input, shape index: {}]   ;;  %s1424_s1 = inlined_call_operand.vmem [shape: f32[2,128,10], index: 1, kind: input, shape index: {}]   ;;  %s1425_s2 = inlined_call_operand.hbm [shape: f32[1,2,128], index: 2, kind: output, shape index: {0}]   ;;  %s1426_s3 = inlined_call_operand.hbm [shape: f32[1,2,128], index: 3, kind: output, shape index: {1}]  }
   0x1   :  { %v62_v0 = vld [vmem:[%s1424_s1 + $0x78] sm:$0xff]  ;;  %v61_v2 = vld [vmem:[%s1424_s1 + $0x70] sm:$0xff]  ;;  %v60_v4 = vld [vmem:[%s1424_s1 + $0x68] sm:$0xff] }
   0x2   :  { %v78_v1 = vld [vmem:[%s1424_s1 + $0xf8] sm:$0xff]  ;;  %850 = vmatpush.xpose.msk.msra.mxu0 %vm79_vm0, %v62_v0  ;;  %914 = vmatpush.xpose.msk.msra.mxu2 %vm79_vm0, %v62_v0  ;;  %v77_v3 = vld [vmem:[%s1424_s1 + $0xf0] sm:$0xff]  ;;  %v76_v5 = vld [vmem:[%s1424_s1 + $0xe8] sm:$0xff] }
   0x3   :  { %882 = vmatpush.xpose.msk.msra.mxu1 %vm79_vm0, %v78_v1  ;;  %930 = vmatpush.xpose.msk.msra.mxu3 %vm79_vm0, %v78_v1 }
   0x6   :  { %851 = vmatpush.xpose.msk.msra.mxu0 %vm79_vm0, %v61_v2  ;;  %915 = vmatpush.xpose.msk.msra.mxu2 %vm79_vm0, %v61_v2 }
   0x7   :  { %883 = vmatpush.xpose.msk.msra.mxu1 %vm79_vm0, %v77_v3  ;;  %931 = vmatpush.xpose.msk.msra.mxu3 %vm79_vm0, %v77_v3 }
   0x8   :  { %10 = vsyncpa [#allocation5], 0  ;;  %v59_v6 = vld [vmem:[%s1424_s1 + $0x60] sm:$0xff]  ;;  %v58_v8 = vld [vmem:[%s1424_s1 + $0x58] sm:$0xff]  ;;  %s821_s30 = sshll.u32 %s1425_s2, 4  ;;  %vm516_vm1 = vcmask 1041409   ;;  %s822_s30 = int_to_ptr.hbm [resolvable:$true] %s821_s30 }
   0x9   :  { %v75_v7 = vld [vmem:[%s1424_s1 + $0xe0] sm:$0xff]  ;;  %v74_v9 = vld [vmem:[%s1424_s1 + $0xd8] sm:$0xff]  ;;  %v57_v10 = vld [vmem:[%s1424_s1 + $0x50] sm:$0xff]  ;;  %s1000_s4 = smov [#allocation2]   ;;  %vm579_vm2 = vcmask 130112   ;;  %vm583_vm3 = vcmask 195712  }
   0xa   :  { %852 = vmatpush.xpose.msk.msra.mxu0 %vm79_vm0, %v60_v4  ;;  %916 = vmatpush.xpose.msk.msra.mxu2 %vm79_vm0, %v60_v4  ;;  %v73_v11 = vld [vmem:[%s1424_s1 + $0xd0] sm:$0xff]  ;;  %v56_v12 = vld [vmem:[%s1424_s1 + $0x48] sm:$0xff]  ;;  %v55_v14 = vld [vmem:[%s1424_s1 + $0x40] sm:$0xff]  ;;  %s819_s5 = sshll.u32 %s1000_s4, 4  ;;  %vm587_vm4 = vcmask 261312   ;;  %vm591_vm5 = vcmask 326912   ;;  %s820_s5 = int_to_ptr.vmem [resolvable:$true] %s819_s5 }
   0xb   :  { %884 = vmatpush.xpose.msk.msra.mxu1 %vm79_vm0, %v76_v5  ;;  %932 = vmatpush.xpose.msk.msra.mxu3 %vm79_vm0, %v76_v5  ;;  %v72_v13 = vld [vmem:[%s1424_s1 + $0xc8] sm:$0xff]  ;;  %v71_v15 = vld [vmem:[%s1424_s1 + $0xc0] sm:$0xff]  ;;  %v54_v16 = vld [vmem:[%s1424_s1 + $0x38] sm:$0xff]  ;;  %vm599_vm6 = vcmask 458112   ;;  %vm595_vm7 = vcmask 392512   ;;  %vm603_vm8 = vcmask 523712  }
   0xc   :  { %v70_v17 = vld [vmem:[%s1424_s1 + $0xb8] sm:$0xff]  ;;  %v53_v18 = vld [vmem:[%s1424_s1 + $0x30] sm:$0xff]  ;;  %v52_v20 = vld [vmem:[%s1424_s1 + $0x28] sm:$0xff]  ;;  %vm607_vm9 = vcmask 589312   ;;  %vm611_vm10 = vcmask 654912   ;;  %vm615_vm11 = vcmask 720512  }
   0xd   :  { %v69_v19 = vld [vmem:[%s1424_s1 + $0xb0] sm:$0xff]  ;;  %v68_v21 = vld [vmem:[%s1424_s1 + $0xa8] sm:$0xff]  ;;  %v51_v22 = vld [vmem:[%s1424_s1 + $0x20] sm:$0xff]  ;;  %vm619_vm12 = vcmask 786112   ;;  %vm623_vm13 = vcmask 851712   ;;  %vm627_vm14 = vcmask 917312  }
   0xe   :  { %853 = vmatpush.xpose.msk.msra.mxu0 %vm79_vm0, %v59_v6  ;;  %917 = vmatpush.xpose.msk.msra.mxu2 %vm79_vm0, %v59_v6  ;;  %v67_v23 = vld [vmem:[%s1424_s1 + $0xa0] sm:$0xff]  ;;  %v50_v24 = vld [vmem:[%s1424_s1 + $0x18] sm:$0xff]  ;;  %v49_v26 = vld [vmem:[%s1424_s1 + $0x10] sm:$0xff]  ;;  %vm631_vm15 = vcmask 982912   ;;  %s1001_s2 = smov [#allocation4]   ;;  %s832_s9 = sshll.u32 %s1426_s3, 4  ;;  %s833_s9 = int_to_ptr.hbm [resolvable:$true] %s832_s9 }
   0xf   :  { %885 = vmatpush.xpose.msk.msra.mxu1 %vm79_vm0, %v75_v7  ;;  %933 = vmatpush.xpose.msk.msra.mxu3 %vm79_vm0, %v75_v7  ;;  %v66_v25 = vld [vmem:[%s1424_s1 + $0x98] sm:$0xff]  ;;  %v65_v27 = vld [vmem:[%s1424_s1 + $0x90] sm:$0xff]  ;;  %v48_v28 = vld [vmem:[%s1424_s1 + $0x8] sm:$0xff]  ;;  %s830_s6 = sshll.u32 %s1001_s2, 4  ;;  %s831_s6 = int_to_ptr.vmem [resolvable:$true] %s830_s6 }
  0x10   :  { %v64_v29 = vld [vmem:[%s1424_s1 + $0x88] sm:$0xff]  ;;  %v47_v30 = vld [vmem:[%s1424_s1] sm:$0xff]  ;;  %v17_v40 = vld [vmem:[%s1423_s0 + $0x10] sm:$0xff] }
  0x11   :  { %v63_v31 = vld [vmem:[%s1424_s1 + $0x80] sm:$0xff]  ;;  %v16_v36 = vld [vmem:[%s1423_s0 + $0x8] sm:$0xff]  ;;  %v25_v41 = vld [vmem:[%s1423_s0 + $0x50] sm:$0xff] }
  0x12   :  { %854 = vmatpush.xpose.msk.msra.mxu0 %vm79_vm0, %v58_v8  ;;  %918 = vmatpush.xpose.msk.msra.mxu2 %vm79_vm0, %v58_v8  ;;  %v15_v32 = vld [vmem:[%s1423_s0] sm:$0xff]  ;;  %v24_v37 = vld [vmem:[%s1423_s0 + $0x48] sm:$0xff]  ;;  %v33_v42 = vld [vmem:[%s1423_s0 + $0x90] sm:$0xff] }
  0x13   :  { %886 = vmatpush.xpose.msk.msra.mxu1 %vm79_vm0, %v74_v9  ;;  %934 = vmatpush.xpose.msk.msra.mxu3 %vm79_vm0, %v74_v9  ;;  %v23_v33 = vld [vmem:[%s1423_s0 + $0x40] sm:$0xff]  ;;  %v32_v38 = vld [vmem:[%s1423_s0 + $0x88] sm:$0xff]  ;;  %v41_v43 = vld [vmem:[%s1423_s0 + $0xd0] sm:$0xff] }
  0x14   :  { %v31_v34 = vld [vmem:[%s1423_s0 + $0x80] sm:$0xff]  ;;  %v40_v39 = vld [vmem:[%s1423_s0 + $0xc8] sm:$0xff]  ;;  %v18_v44 = vld [vmem:[%s1423_s0 + $0x18] sm:$0xff] }
  0x15   :  { %v39_v35 = vld [vmem:[%s1423_s0 + $0xc0] sm:$0xff]  ;;  %v26_v45 = vld [vmem:[%s1423_s0 + $0x58] sm:$0xff]  ;;  %v20_v52 = vld [vmem:[%s1423_s0 + $0x28] sm:$0xff] }
  0x16   :  { %855 = vmatpush.xpose.msk.msra.mxu0 %vm79_vm0, %v57_v10  ;;  %919 = vmatpush.xpose.msk.msra.mxu2 %vm79_vm0, %v57_v10  ;;  %v34_v46 = vld [vmem:[%s1423_s0 + $0x98] sm:$0xff]  ;;  %v19_v48 = vld [vmem:[%s1423_s0 + $0x20] sm:$0xff]  ;;  %v28_v53 = vld [vmem:[%s1423_s0 + $0x68] sm:$0xff] }
  0x17   :  { %887 = vmatpush.xpose.msk.msra.mxu1 %vm79_vm0, %v73_v11  ;;  %935 = vmatpush.xpose.msk.msra.mxu3 %vm79_vm0, %v73_v11  ;;  %v42_v47 = vld [vmem:[%s1423_s0 + $0xd8] sm:$0xff]  ;;  %v27_v49 = vld [vmem:[%s1423_s0 + $0x60] sm:$0xff]  ;;  %v36_v54 = vld [vmem:[%s1423_s0 + $0xa8] sm:$0xff] }
  0x18   :  { %v35_v50 = vld [vmem:[%s1423_s0 + $0xa0] sm:$0xff]  ;;  %v44_v55 = vld [vmem:[%s1423_s0 + $0xe8] sm:$0xff]  ;;  %v21_v56 = vld [vmem:[%s1423_s0 + $0x30] sm:$0xff] }
  0x19   :  { %v43_v51 = vld [vmem:[%s1423_s0 + $0xe0] sm:$0xff]  ;;  %v29_v57 = vld [vmem:[%s1423_s0 + $0x70] sm:$0xff]  ;;  %v22_v60 = vld [vmem:[%s1423_s0 + $0x38] sm:$0xff] }
  0x1a   :  { %856 = vmatpush.xpose.msk.msra.mxu0 %vm79_vm0, %v56_v12  ;;  %920 = vmatpush.xpose.msk.msra.mxu2 %vm79_vm0, %v56_v12  ;;  %v37_v58 = vld [vmem:[%s1423_s0 + $0xb0] sm:$0xff]  ;;  %v30_v61 = vld [vmem:[%s1423_s0 + $0x78] sm:$0xff] }
  0x1b   :  { %888 = vmatpush.xpose.msk.msra.mxu1 %vm79_vm0, %v72_v13  ;;  %936 = vmatpush.xpose.msk.msra.mxu3 %vm79_vm0, %v72_v13  ;;  %v45_v59 = vld [vmem:[%s1423_s0 + $0xf0] sm:$0xff]  ;;  %v38_v62 = vld [vmem:[%s1423_s0 + $0xb8] sm:$0xff] }
  0x1c   :  { %v46_v63 = vld [vmem:[%s1423_s0 + $0xf8] sm:$0xff] }
  0x1e   :  { %857 = vmatpush.xpose.msk.msra.mxu0 %vm79_vm0, %v55_v14  ;;  %921 = vmatpush.xpose.msk.msra.mxu2 %vm79_vm0, %v55_v14 }
  0x1f   :  { %889 = vmatpush.xpose.msk.msra.mxu1 %vm79_vm0, %v71_v15  ;;  %937 = vmatpush.xpose.msk.msra.mxu3 %vm79_vm0, %v71_v15 }
  0x22   :  { %858 = vmatpush.xpose.msk.msra.mxu0 %vm79_vm0, %v54_v16  ;;  %922 = vmatpush.xpose.msk.msra.mxu2 %vm79_vm0, %v54_v16 }
  0x23   :  { %890 = vmatpush.xpose.msk.msra.mxu1 %vm79_vm0, %v70_v17  ;;  %938 = vmatpush.xpose.msk.msra.mxu3 %vm79_vm0, %v70_v17 }
  0x26   :  { %859 = vmatpush.xpose.msk.msra.mxu0 %vm79_vm0, %v53_v18  ;;  %923 = vmatpush.xpose.msk.msra.mxu2 %vm79_vm0, %v53_v18 }
  0x27   :  { %891 = vmatpush.xpose.msk.msra.mxu1 %vm79_vm0, %v69_v19  ;;  %939 = vmatpush.xpose.msk.msra.mxu3 %vm79_vm0, %v69_v19 }
  0x2a   :  { %860 = vmatpush.xpose.msk.msra.mxu0 %vm79_vm0, %v52_v20  ;;  %924 = vmatpush.xpose.msk.msra.mxu2 %vm79_vm0, %v52_v20 }
  0x2b   :  { %892 = vmatpush.xpose.msk.msra.mxu1 %vm79_vm0, %v68_v21  ;;  %940 = vmatpush.xpose.msk.msra.mxu3 %vm79_vm0, %v68_v21 }
  0x2e   :  { %861 = vmatpush.xpose.msk.msra.mxu0 %vm79_vm0, %v51_v22  ;;  %925 = vmatpush.xpose.msk.msra.mxu2 %vm79_vm0, %v51_v22 }
  0x2f   :  { %893 = vmatpush.xpose.msk.msra.mxu1 %vm79_vm0, %v67_v23  ;;  %941 = vmatpush.xpose.msk.msra.mxu3 %vm79_vm0, %v67_v23 }
  0x32   :  { %862 = vmatpush.xpose.msk.msra.mxu0 %vm79_vm0, %v50_v24  ;;  %926 = vmatpush.xpose.msk.msra.mxu2 %vm79_vm0, %v50_v24 }
  0x33   :  { %894 = vmatpush.xpose.msk.msra.mxu1 %vm79_vm0, %v66_v25  ;;  %942 = vmatpush.xpose.msk.msra.mxu3 %vm79_vm0, %v66_v25 }
  0x36   :  { %863 = vmatpush.xpose.msk.msra.mxu0 %vm79_vm0, %v49_v26  ;;  %927 = vmatpush.xpose.msk.msra.mxu2 %vm79_vm0, %v49_v26 }
  0x37   :  { %895 = vmatpush.xpose.msk.msra.mxu1 %vm79_vm0, %v65_v27  ;;  %943 = vmatpush.xpose.msk.msra.mxu3 %vm79_vm0, %v65_v27 }
  0x3a   :  { %864 = vmatpush.xpose.msk.msra.mxu0 %vm79_vm0, %v48_v28  ;;  %928 = vmatpush.xpose.msk.msra.mxu2 %vm79_vm0, %v48_v28 }
  0x3b   :  { %896 = vmatpush.xpose.msk.msra.mxu1 %vm79_vm0, %v64_v29  ;;  %944 = vmatpush.xpose.msk.msra.mxu3 %vm79_vm0, %v64_v29 }
  0x3e   :  { %865 = vmatpush.xpose.msk.msra.mxu0 %vm79_vm0, %v47_v30  ;;  %929 = vmatpush.xpose.msk.msra.mxu2 %vm79_vm0, %v47_v30 }
  0x3f   :  { %897 = vmatpush.xpose.msk.msra.mxu1 %vm79_vm0, %v63_v31  ;;  %945 = vmatpush.xpose.msk.msra.mxu3 %vm79_vm0, %v63_v31 }
  0x41   :  { %866 = vmatmul.msk.f32.vlgmr.msra.gmra.mxu0 %vm79_vm0, %v15_v32  ;;  %874 = vmatmul.msk.f32.vlgmr.msra.gmra.mxu2 %vm79_vm0, %v23_v33 }
  0x42   :  { %898 = vmatmul.msk.f32.vlgmr.msra.gmra.mxu1 %vm79_vm0, %v31_v34  ;;  %906 = vmatmul.msk.f32.vlgmr.msra.gmra.mxu3 %vm79_vm0, %v39_v35 }
  0x49   :  { %867 = vmatmul.msk.f32.gmra.mxu0 %vm79_vm0, %v16_v36  ;;  %875 = vmatmul.msk.f32.gmra.mxu2 %vm79_vm0, %v24_v37 }
  0x4a   :  { %899 = vmatmul.msk.f32.gmra.mxu1 %vm79_vm0, %v32_v38  ;;  %907 = vmatmul.msk.f32.gmra.mxu3 %vm79_vm0, %v40_v39 }
  0x51   :  { %868 = vmatmul.msk.f32.gmra.mxu0 %vm79_vm0, %v17_v40  ;;  %876 = vmatmul.msk.f32.gmra.mxu2 %vm79_vm0, %v25_v41 }
  0x52   :  { %900 = vmatmul.msk.f32.gmra.mxu1 %vm79_vm0, %v33_v42  ;;  %908 = vmatmul.msk.f32.gmra.mxu3 %vm79_vm0, %v41_v43 }
  0x59   :  { %869 = vmatmul.msk.f32.gmra.mxu0 %vm79_vm0, %v18_v44  ;;  %877 = vmatmul.msk.f32.gmra.mxu2 %vm79_vm0, %v26_v45 }
  0x5a   :  { %901 = vmatmul.msk.f32.gmra.mxu1 %vm79_vm0, %v34_v46  ;;  %909 = vmatmul.msk.f32.gmra.mxu3 %vm79_vm0, %v42_v47 }
  0x61   :  { %870 = vmatmul.msk.f32.gmra.mxu0 %vm79_vm0, %v19_v48  ;;  %878 = vmatmul.msk.f32.gmra.mxu2 %vm79_vm0, %v27_v49 }
  0x62   :  { %902 = vmatmul.msk.f32.gmra.mxu1 %vm79_vm0, %v35_v50  ;;  %910 = vmatmul.msk.f32.gmra.mxu3 %vm79_vm0, %v43_v51 }
  0x69   :  { %871 = vmatmul.msk.f32.gmra.mxu0 %vm79_vm0, %v20_v52  ;;  %879 = vmatmul.msk.f32.gmra.mxu2 %vm79_vm0, %v28_v53 }
  0x6a   :  { %903 = vmatmul.msk.f32.gmra.mxu1 %vm79_vm0, %v36_v54  ;;  %911 = vmatmul.msk.f32.gmra.mxu3 %vm79_vm0, %v44_v55 }
  0x71   :  { %872 = vmatmul.msk.f32.gmra.mxu0 %vm79_vm0, %v21_v56  ;;  %880 = vmatmul.msk.f32.gmra.mxu2 %vm79_vm0, %v29_v57 }
  0x72   :  { %904 = vmatmul.msk.f32.gmra.mxu1 %vm79_vm0, %v37_v58  ;;  %912 = vmatmul.msk.f32.gmra.mxu3 %vm79_vm0, %v45_v59 }
  0x79   :  { %873 = vmatmul.msk.f32.gmra.mxu0 %vm79_vm0, %v22_v60  ;;  %881 = vmatmul.msk.f32.gmra.mxu2 %vm79_vm0, %v30_v61 }
  0x7a   :  { %905 = vmatmul.msk.f32.gmra.mxu1 %vm79_vm0, %v38_v62  ;;  %913 = vmatmul.msk.f32.gmra.mxu3 %vm79_vm0, %v46_v63  ;;  %vm635_vm0 = vcmask 1048512  }
  0xbe   :  { %v193_v0 = vpop.f32.mrf.mxu0 }
  0xbf   :  { %v354_v1 = vpop.f32.mrf.mxu1  ;;  %444 = vmin.xlane.f32.xlu0 %v193_v0 }
  0xc0   :  { %476 = vmin.xlane.f32.xlu1 %v354_v1 }
  0xc4   :  { %v217_v2 = vpop.f32.mrf.mxu2 }
  0xc5   :  { %v378_v3 = vpop.f32.mrf.mxu3  ;;  %460 = vmin.xlane.f32.xlu2 %v217_v2 }
  0xc6   :  { %v196_v4 = vpop.f32.mrf.mxu0 }
  0xc7   :  { %v357_v5 = vpop.f32.mrf.mxu1  ;;  %492 = vmin.xlane.f32.xlu0 %v378_v3 }
  0xcc   :  { %v220_v6 = vpop.f32.mrf.mxu2 }
  0xcd   :  { %v381_v7 = vpop.f32.mrf.mxu3  ;;  %478 = vmin.xlane.f32.xlu2 %v357_v5 }
  0xce   :  { %494 = vmin.xlane.f32.xlu1 %v381_v7  ;;  %v199_v8 = vpop.f32.mrf.mxu0 }
  0xcf   :  { %v360_v9 = vpop.f32.mrf.mxu1  ;;  %446 = vmin.xlane.f32.xlu0 %v196_v4  ;;  %v402_v22 = vmin.f32 %v193_v0, %v199_v8 }
  0xd0   :  { %v423_v23 = vmin.f32 %v354_v1, %v360_v9 }
  0xd4   :  { %v223_v10 = vpop.f32.mrf.mxu2 }
  0xd5   :  { %v384_v11 = vpop.f32.mrf.mxu3 }
  0xd6   :  { %496 = vmin.xlane.f32.xlu2 %v384_v11  ;;  %448 = vmin.xlane.f32.xlu1 %v199_v8  ;;  %v202_v12 = vpop.f32.mrf.mxu0 }
  0xd7   :  { %v363_v13 = vpop.f32.mrf.mxu1  ;;  %462 = vmin.xlane.f32.xlu0 %v220_v6  ;;  %v403_v32 = vmin.f32 %v196_v4, %v202_v12 }
  0xd8   :  { %v424_v34 = vmin.f32 %v357_v5, %v363_v13 }
  0xdc   :  { %v226_v14 = vpop.f32.mrf.mxu2 }
  0xdd   :  { %v387_v15 = vpop.f32.mrf.mxu3 }
  0xde   :  { %466 = vmin.xlane.f32.xlu2 %v226_v14  ;;  %464 = vmin.xlane.f32.xlu1 %v223_v10  ;;  %v205_v16 = vpop.f32.mrf.mxu0 }
  0xdf   :  { %v366_v17 = vpop.f32.mrf.mxu1  ;;  %480 = vmin.xlane.f32.xlu0 %v360_v9  ;;  %v404_v25 = vmin.f32 %v402_v22, %v205_v16 }
  0xe0   :  { %v425_v27 = vmin.f32 %v423_v23, %v366_v17 }
  0xe4   :  { %v229_v18 = vpop.f32.mrf.mxu2 }
  0xe5   :  { %v390_v19 = vpop.f32.mrf.mxu3 }
  0xe6   :  { %450 = vmin.xlane.f32.xlu1 %v202_v12  ;;  %452 = vmin.xlane.f32.xlu2 %v205_v16  ;;  %v208_v20 = vpop.f32.mrf.mxu0 }
  0xe7   :  { %v369_v21 = vpop.f32.mrf.mxu1  ;;  %498 = vmin.xlane.f32.xlu0 %v387_v15  ;;  %v405_v37 = vmin.f32 %v403_v32, %v208_v20 }
  0xe8   :  { %v426_v39 = vmin.f32 %v424_v34, %v369_v21 }
  0xec   :  { %v232_v24 = vpop.f32.mrf.mxu2 }
  0xed   :  { %v393_v26 = vpop.f32.mrf.mxu3 }
  0xee   :  { %482 = vmin.xlane.f32.xlu1 %v363_v13  ;;  %484 = vmin.xlane.f32.xlu2 %v366_v17  ;;  %v211_v28 = vpop.f32.mrf.mxu0 }
  0xef   :  { %v406_v29 = vmin.f32 %v404_v25, %v211_v28  ;;  %v372_v30 = vpop.f32.mrf.mxu1  ;;  %468 = vmin.xlane.f32.xlu0 %v229_v18 }
  0xf0   :  { %v427_v31 = vmin.f32 %v425_v27, %v372_v30 }
  0xf1   :  { %v408_v33 = vmin.f32 %v406_v29, %v217_v2 }
  0xf2   :  { %v429_v35 = vmin.f32 %v427_v31, %v378_v3 }
  0xf3   :  { %v410_v42 = vmin.f32 %v408_v33, %v223_v10 }
  0xf4   :  { %v235_v36 = vpop.f32.mrf.mxu2  ;;  %v431_v45 = vmin.f32 %v429_v35, %v384_v11 }
  0xf5   :  { %v396_v38 = vpop.f32.mrf.mxu3  ;;  %v412_v48 = vmin.f32 %v410_v42, %v229_v18 }
  0xf6   :  { %500 = vmin.xlane.f32.xlu1 %v390_v19  ;;  %454 = vmin.xlane.f32.xlu2 %v208_v20  ;;  %v214_v40 = vpop.f32.mrf.mxu0  ;;  %v433_v50 = vmin.f32 %v431_v45, %v390_v19 }
  0xf7   :  { %v407_v41 = vmin.f32 %v405_v37, %v214_v40  ;;  %v375_v43 = vpop.f32.mrf.mxu1  ;;  %486 = vmin.xlane.f32.xlu0 %v369_v21  ;;  %v414_v56 = vmin.f32 %v412_v48, %v235_v36 }
  0xf8   :  { %v428_v44 = vmin.f32 %v426_v39, %v375_v43  ;;  %v435_v58 = vmin.f32 %v433_v50, %v396_v38 }
  0xf9   :  { %v409_v46 = vmin.f32 %v407_v41, %v220_v6 }
  0xfa   :  { %v430_v47 = vmin.f32 %v428_v44, %v381_v7 }
  0xfb   :  { %v411_v49 = vmin.f32 %v409_v46, %v226_v14 }
  0xfc   :  { %v238_v51 = vpop.f32.mrf.mxu2  ;;  %v432_v52 = vmin.f32 %v430_v47, %v387_v15 }
  0xfd   :  { %v413_v53 = vmin.f32 %v411_v49, %v232_v24  ;;  %v399_v54 = vpop.f32.mrf.mxu3 }
  0xfe   :  { %488 = vmin.xlane.f32.xlu1 %v372_v30  ;;  %470 = vmin.xlane.f32.xlu2 %v232_v24  ;;  %v434_v55 = vmin.f32 %v432_v52, %v393_v26  ;;  %v574_v30 = vlaneseq }
  0xff   :  { %v415_v57 = vmin.f32 %v413_v53, %v238_v51  ;;  %456 = vmin.xlane.f32.xlu0 %v211_v28 }
 0x100   :  { %v436_v59 = vmin.f32 %v434_v55, %v399_v54  ;;  %v1346_v33 = vand.u32 127, %v574_v30 }
 0x101   :  { %v416_v60 = vmin.f32 %v414_v56, %v415_v57 }
 0x102   :  { %v437_v61 = vmin.f32 %v435_v58, %v436_v59  ;;  %v577_v35 = vadd.s32 4294967288, %v1346_v33  ;;  %v589_v44 = vadd.s32 4294967264, %v1346_v33  ;;  %v597_v45 = vadd.s32 4294967248, %v1346_v33 }
 0x103   :  { %v417_v62 = vrot.slane %v416_v60, 4  ;;  %v593_v48 = vadd.s32 4294967256, %v1346_v33  ;;  %v601_v53 = vadd.s32 4294967240, %v1346_v33  ;;  %v609_v55 = vadd.s32 4294967224, %v1346_v33 }
 0x104   :  { %v438_v63 = vrot.slane %v437_v61, 4  ;;  %v1364_v56 = vadd.s32 4294967216, %v1346_v33 }
 0x105   :  { %v418_v0 = vmin.f32 %v416_v60, %v417_v62 }
 0x106   :  { %v439_v1 = vmin.f32 %v437_v61, %v438_v63  ;;  %472 = vmin.xlane.f32.xlu1 %v235_v36  ;;  %490 = vmin.xlane.f32.xlu2 %v375_v43  ;;  %v581_v36 = vadd.s32 4294967280, %v1346_v33 }
 0x107   :  { %v419_v2 = vrot.slane %v418_v0, 2  ;;  %502 = vmin.xlane.f32.xlu0 %v393_v26 }
 0x108   :  { %v440_v3 = vrot.slane %v439_v1, 2 }
 0x109   :  { %v420_v4 = vmin.f32 %v418_v0, %v419_v2 }
 0x10a   :  { %v441_v5 = vmin.f32 %v439_v1, %v440_v3 }
 0x10b   :  { %v421_v6 = vrot.slane %v420_v4, 1 }
 0x10c   :  { %v442_v7 = vrot.slane %v441_v5, 1 }
 0x10d   :  { %v422_v8 = vmin.f32 %v420_v4, %v421_v6 }
 0x10e   :  { %504 = vmin.xlane.f32.xlu2 %v396_v38  ;;  %458 = vmin.xlane.f32.xlu1 %v214_v40  ;;  %v443_v9 = vmin.f32 %v441_v5, %v442_v7  ;;  %v585_v38 = vadd.s32 4294967272, %v1346_v33 }
 0x10f   :  { %474 = vmin.xlane.f32.xlu0 %v238_v51 }
 0x110   :  { %v517_v10 = vsel %vm516_vm1, %v443_v9, %v422_v8 }
 0x111   :  { %522 = vst [vmem:[#allocation2] sm:$0x3] %v517_v10 }
 0x112   :  { %824 = dma.vmem_to_hbm [thread:$0]  %s820_s5, 32, %s822_s30, [#allocation3]  }
 0x116   :  { %506 = vmin.xlane.f32.xlu1 %v399_v54  ;;  %v605_v54 = vadd.s32 4294967232, %v1346_v33 }
 0x132   :  { %v1314_v11 = vpop.xlane.xlu0 %444 }
 0x133   :  { %v477_v12 = vpop.xlane.xlu1 %476  ;;  %v576_v58 = vperm.slane %v1314_v11, %v1346_v33 }
 0x134   :  { %v637_v42 = vperm.slane %v477_v12, %v1346_v33 }
 0x138   :  { %v1316_v13 = vpop.xlane.xlu2 %460 }
 0x13a   :  { %v1318_v14 = vpop.xlane.xlu0 %492 }
 0x13b   :  { %v652_v3 = vperm.slane %v1318_v14, %v605_v54  ;;  %v617_v14 = vadd.s32 4294967208, %v1346_v33 }
 0x140   :  { %v479_v15 = vpop.xlane.xlu2 %478 }
 0x141   :  { %v1320_v16 = vpop.xlane.xlu1 %494  ;;  %v638_v37 = vperm.slane %v479_v15, %v577_v35 }
 0x142   :  { %v1322_v17 = vpop.xlane.xlu0 %446  ;;  %v654_v5 = vperm.slane %v1320_v16, %v609_v55 }
 0x143   :  { %v639_v47 = vsel %vm579_vm2, %v638_v37, %v637_v42  ;;  %v578_v59 = vperm.slane %v1322_v17, %v577_v35  ;;  %v633_v42 = vadd.s32 4294967176, %v1346_v33 }
 0x145   :  { %v580_v6 = vsel %vm579_vm2, %v578_v59, %v576_v58 }
 0x149   :  { %v1324_v18 = vpop.xlane.xlu2 %496  ;;  %v1326_v19 = vpop.xlane.xlu1 %448 }
 0x14a   :  { %v1328_v20 = vpop.xlane.xlu0 %462  ;;  %v582_v60 = vperm.slane %v1326_v19, %v581_v36  ;;  %v656_v8 = vperm.slane %v1324_v18, %v1364_v56  ;;  %v621_v19 = vadd.s32 4294967200, %v1346_v33 }
 0x14b   :  { %v610_v35 = vperm.slane %v1328_v20, %v609_v55 }
 0x14c   :  { %v584_v9 = vsel %vm583_vm3, %v582_v60, %v580_v6 }
 0x151   :  { %v1330_v21 = vpop.xlane.xlu2 %466  ;;  %v1332_v22 = vpop.xlane.xlu1 %464 }
 0x152   :  { %v481_v23 = vpop.xlane.xlu0 %480 }
 0x153   :  { %v640_v39 = vperm.slane %v481_v23, %v581_v36 }
 0x155   :  { %v641_v49 = vsel %vm583_vm3, %v640_v39, %v639_v47 }
 0x159   :  { %v1334_v24 = vpop.xlane.xlu1 %450  ;;  %v1336_v25 = vpop.xlane.xlu2 %452 }
 0x15a   :  { %v1338_v26 = vpop.xlane.xlu0 %498  ;;  %v586_v0 = vperm.slane %v1334_v24, %v585_v38  ;;  %v590_v10 = vperm.slane %v1336_v25, %v589_v44 }
 0x15b   :  { %v658_v24 = vperm.slane %v1338_v26, %v617_v14  ;;  %v614_v26 = vperm.slane %v1332_v22, %v1364_v56 }
 0x15c   :  { %v588_v15 = vsel %vm587_vm4, %v586_v0, %v584_v9 }
 0x15d   :  { %v592_v25 = vsel %vm591_vm5, %v590_v10, %v588_v15 }
 0x161   :  { %v483_v27 = vpop.xlane.xlu1 %482  ;;  %v485_v28 = vpop.xlane.xlu2 %484 }
 0x162   :  { %v1340_v29 = vpop.xlane.xlu0 %468  ;;  %v642_v43 = vperm.slane %v483_v27, %v585_v38  ;;  %v644_v50 = vperm.slane %v485_v28, %v589_v44  ;;  %v625_v38 = vadd.s32 4294967192, %v1346_v33  ;;  %v618_v44 = vperm.slane %v1330_v21, %v617_v14 }
 0x164   :  { %v643_v51 = vsel %vm587_vm4, %v642_v43, %v641_v49  ;;  %v629_v43 = vadd.s32 4294967184, %v1346_v33 }
 0x165   :  { %v645_v61 = vsel %vm591_vm5, %v644_v50, %v643_v51 }
 0x169   :  { %v1342_v31 = vpop.xlane.xlu1 %500  ;;  %v1344_v32 = vpop.xlane.xlu2 %454 }
 0x16a   :  { %v487_v34 = vpop.xlane.xlu0 %486  ;;  %v594_v16 = vperm.slane %v1344_v32, %v593_v48  ;;  %v606_v32 = vperm.slane %v1316_v13, %v605_v54  ;;  %v660_v36 = vperm.slane %v1342_v31, %v621_v19 }
 0x16b   :  { %v646_v52 = vperm.slane %v487_v34, %v593_v48 }
 0x16c   :  { %v596_v28 = vsel %vm595_vm7, %v594_v16, %v592_v25 }
 0x16d   :  { %v647_v1 = vsel %vm595_vm7, %v646_v52, %v645_v61 }
 0x171   :  { %v489_v40 = vpop.xlane.xlu1 %488  ;;  %v1351_v41 = vpop.xlane.xlu2 %470 }
 0x172   :  { %v457_v46 = vpop.xlane.xlu0 %456  ;;  %v648_v57 = vperm.slane %v489_v40, %v597_v45  ;;  %v626_v49 = vperm.slane %v1351_v41, %v625_v38 }
 0x173   :  { %v598_v23 = vperm.slane %v457_v46, %v597_v45  ;;  %v622_v46 = vperm.slane %v1340_v29, %v621_v19 }
 0x174   :  { %v649_v4 = vsel %vm599_vm6, %v648_v57, %v647_v1 }
 0x175   :  { %v600_v37 = vsel %vm599_vm6, %v598_v23, %v596_v28 }
 0x179   :  { %v1371_v62 = vpop.xlane.xlu1 %472  ;;  %v491_v63 = vpop.xlane.xlu2 %490 }
 0x17a   :  { %v650_v2 = vperm.slane %v491_v63, %v601_v53  ;;  %v503_v12 = vpop.xlane.xlu0 %502  ;;  %v630_v52 = vperm.slane %v1371_v62, %v629_v43 }
 0x17b   :  { %v662_v45 = vperm.slane %v503_v12, %v625_v38 }
 0x17c   :  { %v651_v7 = vsel %vm603_vm8, %v650_v2, %v649_v4 }
 0x17d   :  { %v653_v11 = vsel %vm607_vm9, %v652_v3, %v651_v7 }
 0x17e   :  { %v655_v17 = vsel %vm611_vm10, %v654_v5, %v653_v11 }
 0x17f   :  { %v657_v18 = vsel %vm615_vm11, %v656_v8, %v655_v17 }
 0x180   :  { %v659_v30 = vsel %vm619_vm12, %v658_v24, %v657_v18 }
 0x181   :  { %v459_v27 = vpop.xlane.xlu1 %458  ;;  %v505_v39 = vpop.xlane.xlu2 %504  ;;  %v661_v13 = vsel %vm623_vm13, %v660_v36, %v659_v30 }
 0x182   :  { %v602_v34 = vperm.slane %v459_v27, %v601_v53  ;;  %v475_v31 = vpop.xlane.xlu0 %474  ;;  %v664_v47 = vperm.slane %v505_v39, %v629_v43  ;;  %v663_v33 = vsel %vm627_vm14, %v662_v45, %v661_v13 }
 0x183   :  { %v634_v51 = vperm.slane %v475_v31, %v633_v42 }
 0x184   :  { %v604_v40 = vsel %vm603_vm8, %v602_v34, %v600_v37  ;;  %v665_v54 = vsel %vm631_vm15, %v664_v47, %v663_v33 }
 0x185   :  { %v608_v20 = vsel %vm607_vm9, %v606_v32, %v604_v40 }
 0x186   :  { %v612_v22 = vsel %vm611_vm10, %v610_v35, %v608_v20 }
 0x187   :  { %v616_v48 = vsel %vm615_vm11, %v614_v26, %v612_v22 }
 0x188   :  { %v620_v50 = vsel %vm619_vm12, %v618_v44, %v616_v48 }
 0x189   :  { %v624_v21 = vsel %vm623_vm13, %v622_v46, %v620_v50  ;;  %v507_v53 = vpop.xlane.xlu1 %506 }
 0x18a   :  { %v628_v29 = vsel %vm627_vm14, %v626_v49, %v624_v21  ;;  %v666_v41 = vperm.slane %v507_v53, %v633_v42 }
 0x18b   :  { %v632_v55 = vsel %vm631_vm15, %v630_v52, %v628_v29 }
 0x18c   :  { %v636_v56 = vsel %vm635_vm0, %v634_v51, %v632_v55  ;;  %v667_v57 = vsel %vm635_vm0, %v666_v41, %v665_v54 }
 0x18d   :  { %v669_v58 = vsel %vm516_vm1, %v667_v57, %v636_v56 }
 0x18e   :  { %674 = vst [vmem:[#allocation4] sm:$0x3] %v669_v58 }
 0x18f   :  { %835 = dma.vmem_to_hbm [thread:$0]  %s831_s6, 32, %s833_s9, [#allocation5]  }
 0x190   :  { %996 = dma.done.wait [#allocation3], 32  }
 0x191   :  { %997 = vsyncadd [#allocation3], 4294967264 }
 0x192   :  { %998 = dma.done.wait [#allocation5], 32  }
 0x193   :  { %999 = vsyncadd [#allocation5], 4294967264 }
 0x194   :  { %844 = vsyncpa [#allocation3], 1 }
 0x195   :  { %845 = vsyncpa [#allocation5], 1 }

</bundles_post_ra>
